<compile_context>
chip_gen: v7x
topology: tpu7x:2x2x1
jax: 0.10.0
libtpu: 0.0.40
codegen_flags: <defaults>
</compile_context>

<pallas_src>
import functools

import jax
import jax.numpy as jnp
from jax.experimental import pallas as pl
from jax.experimental.pallas import tpu as pltpu


def _ce_kernel(logits_ref, labels_ref, out_ref, acc_ref, *, n_rows, tile_n):
    # logits_ref: (tile_n, C) native dtype in VMEM
    # labels_ref: (tile_n, 1) int32 in VMEM
    # out_ref:    (1, 1) f32 in SMEM (final mean loss)
    # acc_ref:    (1,)   f32 SMEM scratch (running sum of per-row losses)
    i = pl.program_id(0)

    @pl.when(i == 0)
    def _init():
        acc_ref[0] = jnp.float32(0.0)

    x = logits_ref[...].astype(jnp.float32)            # (tile_n, C)
    labels = labels_ref[...]                           # (tile_n, 1) int32

    # Validity mask for the ragged last tile; zero padded rows *before* exp so
    # stale VMEM bits can never produce NaN/Inf.
    row = i * tile_n + jax.lax.broadcasted_iota(jnp.int32, (tile_n, 1), 0)
    valid = row < n_rows                               # (tile_n, 1)
    x = jnp.where(valid, x, jnp.float32(0.0))

    # Numerically stable logsumexp over classes; everything stays (tile_n, 1).
    m = jnp.max(x, axis=-1, keepdims=True)             # (tile_n, 1)
    lse = m + jnp.log(jnp.sum(jnp.exp(x - m), axis=-1, keepdims=True))

    # Gather the true-class logit via a one-hot compare (no dynamic gather).
    # TODO(synk): for very large C (>= ~4K) chunk the class axis with an
    # online logsumexp / running-pick loop to bound vreg live range.
    col = jax.lax.broadcasted_iota(jnp.int32, x.shape, 1)
    picked = jnp.sum(jnp.where(col == labels, x, jnp.float32(0.0)),
                     axis=-1, keepdims=True)           # (tile_n, 1)

    losses = jnp.where(valid, lse - picked, jnp.float32(0.0))  # (tile_n, 1)
    acc_ref[0] += jnp.sum(losses)

    @pl.when(i == pl.num_programs(0) - 1)
    def _finalize():
        out_ref[0, 0] = acc_ref[0] / jnp.float32(n_rows)


def bdd_loss(output: jax.Array, label: jax.Array, tile_n: int | None = None) -> jax.Array:
    """Pallas implementation of nn.CrossEntropyLoss()(output, label).

    output: (N, C) float logits (any float dtype; DMA'd as-is)
    label:  (N,)   integer class indices in [0, C)
    returns: scalar float32 loss
    """
    n, c = output.shape
    itemsize = jnp.dtype(output.dtype).itemsize

    if tile_n is None:
        # Biggest batch tile whose logits block (x2 double-buffering, x2 inputs)
        # stays comfortably under the ~32 MiB scoped VMEM limit on v7x.
        budget = 4 * 1024 * 1024
        tile_n = max(8, min(1024, (budget // max(1, c * itemsize)) // 8 * 8))
    tile_n = ((tile_n + 7) // 8) * 8                   # sublane multiple
    tile_n = max(8, min(tile_n, ((n + 7) // 8) * 8))   # don't exceed padded N

    num_tiles = pl.cdiv(n, tile_n)
    labels2d = label.astype(jnp.int32).reshape(n, 1)

    cost = pl.CostEstimate(
        flops=5 * n * c,                 # max, sub, sum, compare/select, pick-sum
        transcendentals=n * c,           # the exp (EUP-bound)
        bytes_accessed=n * c * itemsize + n * 4 + 4,
    )

    loss = pl.pallas_call(
        functools.partial(_ce_kernel, n_rows=n, tile_n=tile_n),
        out_shape=jax.ShapeDtypeStruct((1, 1), jnp.float32),
        grid=(num_tiles,),
        in_specs=[
            pl.BlockSpec((tile_n, c), lambda i: (i, 0)),   # logits tile
            pl.BlockSpec((tile_n, 1), lambda i: (i, 0)),   # labels tile
        ],
        out_specs=pl.BlockSpec(memory_space=pltpu.SMEM),
        scratch_shapes=[pltpu.SMEM((1,), jnp.float32)],
        compiler_params=pltpu.CompilerParams(
            dimension_semantics=("arbitrary",)),           # scalar accumulator
        cost_estimate=cost,
    )(output, labels2d)
    return loss[0, 0]


if __name__ == "__main__":
    key = jax.random.PRNGKey(0)
    k1, k2 = jax.random.split(key)

    # Small shapes; N=20 with tile_n=8 -> 3 grid steps, last tile ragged,
    # exercising both the multi-tile accumulation and the row masking.
    N, C = 20, 32
    logits = jax.random.normal(k1, (N, C), dtype=jnp.float32)
    labels = jax.random.randint(k2, (N,), 0, C, dtype=jnp.int32)

    loss = bdd_loss(logits, labels, tile_n=8)
    jax.block_until_ready(loss)

    # Pure-JAX reference (same semantics as torch CE with mean reduction).
    ref = jnp.mean(
        jax.nn.logsumexp(logits, axis=-1)
        - jnp.take_along_axis(logits, labels[:, None], axis=-1)[:, 0]
    )
    assert jnp.allclose(loss, ref, atol=1e-5, rtol=1e-5), (loss, ref)

    print("KERNEL_OK")
</pallas_src>

<mosaic_0001>
module attributes {stable_mosaic.version = 11 : i64} {
  func.func @_ce_kernel(%arg0: i32, %arg1: memref<8x32xf32, #tpu.memory_space<vmem>>, %arg2: memref<8x1xi32, #tpu.memory_space<vmem>>, %arg3: memref<1x1xf32, #tpu.memory_space<smem>>, %arg4: memref<1xf32, #tpu.memory_space<smem>>) attributes {dimension_semantics = [#tpu.dimension_semantics<arbitrary>], iteration_bounds = array<i64: 3>, scalar_prefetch = 0 : i64, scratch_operands = 1 : i64, tpu.core_type = #tpu.core_type<tc>, window_params = [{transform_indices = @transform_0, window_bounds = array<i64: 8, 32>}, {transform_indices = @transform_1, window_bounds = array<i64: 8, 1>}, {transform_indices = @transform_2, window_bounds = array<i64: 1, 1>}]} {
    %c0_i32 = arith.constant 0 : i32
    %0 = arith.cmpi eq, %arg0, %c0_i32 : i32
    %1 = arith.extui %0 : i1 to i32
    %c0_i32_0 = arith.constant 0 : i32
    %2 = arith.cmpi ne, %1, %c0_i32_0 : i32
    scf.if %2 {
      %cst_13 = arith.constant 0.000000e+00 : f32
      %c0_14 = arith.constant 0 : index
      %44 = memref.load %arg4[%c0_14] : memref<1xf32, #tpu.memory_space<smem>>
      memref.store %cst_13, %arg4[%c0_14] : memref<1xf32, #tpu.memory_space<smem>>
    } else {
    }
    %c0 = arith.constant 0 : index
    %c0_1 = arith.constant 0 : index
    %3 = vector.load %arg1[%c0, %c0_1] : memref<8x32xf32, #tpu.memory_space<vmem>>, vector<8x32xf32>
    %c0_2 = arith.constant 0 : index
    %c0_3 = arith.constant 0 : index
    %4 = vector.load %arg2[%c0_2, %c0_3] : memref<8x1xi32, #tpu.memory_space<vmem>>, vector<8x1xi32>
    %c8_i32 = arith.constant 8 : i32
    %5 = arith.muli %arg0, %c8_i32 : i32
    %6 = tpu.iota {dimensions = array<i32: 0>} : vector<8x1xi32>
    %7 = vector.broadcast %5 : i32 to vector<8x1xi32>
    %8 = arith.addi %7, %6 : vector<8x1xi32>
    %c20_i32 = arith.constant 20 : i32
    %9 = vector.broadcast %c20_i32 : i32 to vector<8x1xi32>
    %10 = arith.cmpi slt, %8, %9 : vector<8x1xi32>
    %cst = arith.constant 0.000000e+00 : f32
    %11 = vector.shape_cast %10 : vector<8x1xi1> to vector<8x1xi1>
    %12 = vector.broadcast %11 : vector<8x1xi1> to vector<8x32xi1>
    %13 = vector.broadcast %cst : f32 to vector<8x32xf32>
    %14 = arith.select %12, %3, %13 : vector<8x32xi1>, vector<8x32xf32>
    %cst_4 = arith.constant dense<0xFF800000> : vector<8xf32>
    %15 = vector.multi_reduction <maximumf>, %14, %cst_4 [1] : vector<8x32xf32> to vector<8xf32>
    %16 = vector.shape_cast %15 : vector<8xf32> to vector<8x1xf32>
    %17 = vector.broadcast %16 : vector<8x1xf32> to vector<8x32xf32>
    %18 = arith.subf %14, %17 : vector<8x32xf32>
    %19 = math.exp %18 : vector<8x32xf32>
    %cst_5 = arith.constant dense<0.000000e+00> : vector<8xf32>
    %20 = vector.multi_reduction <add>, %19, %cst_5 [1] : vector<8x32xf32> to vector<8xf32>
    %21 = vector.shape_cast %20 : vector<8xf32> to vector<8x1xf32>
    %22 = math.log %21 : vector<8x1xf32>
    %23 = arith.addf %16, %22 : vector<8x1xf32>
    %24 = tpu.iota {dimensions = array<i32: 1>} : vector<8x32xi32>
    %25 = vector.broadcast %4 : vector<8x1xi32> to vector<8x32xi32>
    %26 = arith.cmpi eq, %24, %25 : vector<8x32xi32>
    %cst_6 = arith.constant 0.000000e+00 : f32
    %27 = vector.broadcast %cst_6 : f32 to vector<8x32xf32>
    %28 = arith.select %26, %14, %27 : vector<8x32xi1>, vector<8x32xf32>
    %cst_7 = arith.constant dense<0.000000e+00> : vector<8xf32>
    %29 = vector.multi_reduction <add>, %28, %cst_7 [1] : vector<8x32xf32> to vector<8xf32>
    %30 = vector.shape_cast %29 : vector<8xf32> to vector<8x1xf32>
    %31 = arith.subf %23, %30 : vector<8x1xf32>
    %cst_8 = arith.constant 0.000000e+00 : f32
    %32 = vector.broadcast %cst_8 : f32 to vector<8x1xf32>
    %33 = arith.select %10, %31, %32 : vector<8x1xi1>, vector<8x1xf32>
    %c0_9 = arith.constant 0 : index
    %34 = memref.load %arg4[%c0_9] : memref<1xf32, #tpu.memory_space<smem>>
    %35 = vector.shape_cast %33 : vector<8x1xf32> to vector<1x8x1xf32>
    %cst_10 = arith.constant dense<0.000000e+00> : vector<1xf32>
    %36 = vector.multi_reduction <add>, %35, %cst_10 [1, 2] : vector<1x8x1xf32> to vector<1xf32>
    %37 = vector.shape_cast %36 : vector<1xf32> to vector<1x1x1xf32>
    %38 = vector.extract %37[0, 0, 0] : f32 from vector<1x1x1xf32>
    %39 = arith.addf %34, %38 : f32
    %c0_11 = arith.constant 0 : index
    %40 = memref.load %arg4[%c0_11] : memref<1xf32, #tpu.memory_space<smem>>
    memref.store %39, %arg4[%c0_11] : memref<1xf32, #tpu.memory_space<smem>>
    %c2_i32 = arith.constant 2 : i32
    %41 = arith.cmpi eq, %arg0, %c2_i32 : i32
    %42 = arith.extui %41 : i1 to i32
    %c0_i32_12 = arith.constant 0 : i32
    %43 = arith.cmpi ne, %42, %c0_i32_12 : i32
    scf.if %43 {
      %c0_13 = arith.constant 0 : index
      %44 = memref.load %arg4[%c0_13] : memref<1xf32, #tpu.memory_space<smem>>
      %cst_14 = arith.constant 2.000000e+01 : f32
      %45 = arith.divf %44, %cst_14 : f32
      %c0_15 = arith.constant 0 : index
      %c0_16 = arith.constant 0 : index
      %46 = memref.load %arg3[%c0_15, %c0_16] : memref<1x1xf32, #tpu.memory_space<smem>>
      memref.store %45, %arg3[%c0_15, %c0_16] : memref<1x1xf32, #tpu.memory_space<smem>>
    } else {
    }
    return
  }
  func.func @transform_0(%arg0: i32) -> (i32, i32) {
    %c0_i32 = arith.constant 0 : i32
    %c0_i32_0 = arith.constant 0 : i32
    return %arg0, %c0_i32 : i32, i32
  }
  func.func @transform_1(%arg0: i32) -> (i32, i32) {
    %c0_i32 = arith.constant 0 : i32
    %c0_i32_0 = arith.constant 0 : i32
    return %arg0, %c0_i32 : i32, i32
  }
  func.func @transform_2(%arg0: i32) -> (i32, i32) {
    %c0_i32 = arith.constant 0 : i32
    %c0_i32_0 = arith.constant 0 : i32
    %c0_i32_1 = arith.constant 0 : i32
    return %c0_i32, %c0_i32_0 : i32, i32
  }
}

</mosaic_0001>

<bundles_post_ra>
// kernel: tpu_custom_call.1
= control target key start
LH: loop header
LB: loop body
LE: loop exit
PB: predicated region body
PF: predicated region fallthrough
CT: control target
= control target key end

     0   :  { %7 = vsyncpa [#allocation4], 0  ;;  %s353_s9 = smov 0   ;;  %s404_s0 = inlined_call_operand.vmem [shape: f32[20,32], index: 0, kind: input, shape index: {}]   ;;  %s405_s1 = inlined_call_operand.vmem [shape: s32[20,1], index: 1, kind: input, shape index: {}]   ;;  %s406_s2 = inlined_call_operand.hbm [shape: f32[1,1], index: 2, kind: output, shape index: {}]  }
   0x1 LB: > { %s359_s10 = sadd.s32 4294967295, %s333_s9   ;;  %p271_p0 = scmp.ge.s32.totalorder %s333_s9, 1  ;;  %s333_s9 = sphi %s353_s9, %s13_s9  }
   0x2   : > { %p116_p1 = scmp.lt.s32.totalorder %s333_s9, 4 }
   0x4   : > { %p117_p2 = pnand %p271_p0, %p116_p1 }
   0x5   : > { %p136_p3 = scmp.lt.s32.totalorder (!%p117_p2), %s359_s10, 2  ;;  %s275_s11 = sshll.u32 (!%p117_p2), %s359_s10, 3  ;;  %v153_v0 = vlaneseq (!%p117_p2)  ;;  %v335_v2 = vmov (!%p117_p2), 0   ;;  %vm161_vm0 = vcmask (!%p117_p2), 261120   ;;  %vm187_vm3 = vcmask (!%p117_p2), 7168  }
   0x6   : > { %120 = sbr.rel (%p117_p2) target bundleno = 554 (0x22a), region = 28  ;;  %v155_v1 = vstv (!%p117_p2), %s275_s11  ;;  %306 = vset.pattern.permute.xlu0 (!%p117_p2), %v335_v2  ;;  %p291_p4 = scmp.eq.s32.totalorder (!%p117_p2), %s359_s10, 0 }
   0x7   : > { %v154_v3 = vshrl.u32 (!%p117_p2), %v153_v0, 7  ;;  %v175_v12 = vand.u32 (!%p117_p2), 127, %v153_v0  ;;  %s336_s20 = smov (!%p117_p2), 0.0   ;;  %p292_p5 = scmp.eq.s32.totalorder (!%p117_p2), %s359_s10, 2 }
   0x8   : > { %s311_s27 = scalar_lea.hbm (!%p117_p2), %s406_s2, 16 }
   0x9   : > { %v156_v4 = vadd.s32 (!%p117_p2), %v155_v1, %v154_v3  ;;  %p312_p6 = scmp.ne.s32.totalorder (!%p117_p2), %s406_s2, %s311_s27  ;;  %p317_p9 = scmp.lt.u32.totalorder (!%p117_p2), %s311_s27, %s406_s2 }
   0xb   : > { %vm157_vm1 = vcmp.lt.s32.totalorder (!%p117_p2), %v156_v4, 20  ;;  %p313_p7 = pnand (!%p117_p2), %p312_p6, %p292_p5 }
   0xd   : > { %s137_s12 = scalar_select %p136_p3, %s359_s10, 2 }
   0xe   : > { %284 = sst [smem:[#allocation2]] (%p291_p4), %s336_s20  ;;  %p314_p8 = pneg %p313_p7 }
   0xf   : > { %s272_s13 = sshll.u32 %s137_s12, 3  ;;  %s186_s21 = sld [smem:[#allocation2]] }
  0x10   : > { %s139_s16 = scalar_lea.vmem %s404_s0, %s272_s13  ;;  %s143_s19 = scalar_lea.vmem %s405_s1, %s272_s13 }
  0x11   : > { %v150_v5 = vld [vmem:[%s139_s16] sm:$0xff]  ;;  %p319_p10 = pnand %p317_p9, %p314_p8 }
  0x12   : > { %v160_v6 = vsel %vm157_vm1, %v150_v5, 0.0  ;;  %v151_v8 = vld [vmem:[%s143_s19] sm:$0xff] }
  0x13   : > { %v162_v7 = vsel %vm161_vm0, %v160_v6, -inf }
  0x14   : > { %163 = vmax.xlane.f32.xlu0 %v162_v7 }
  0x2a   : > { %177 = vperm.xlu0 %306, %v151_v8  }
  0xa1   : > { %v164_v9 = vpop.xlane.xlu0 %163 }
  0xa2   : > { %v165_v10 = vsub.f32 %v160_v6, %v164_v9 }
  0xa4   : > { %v166_v11 = vmul.f32 1.442695, %v165_v10 }
  0xa6   : > { %307 = vpow2.f32 %v166_v11 }
  0xa9   : > { %v178_v13 = vpop.permute.xlu0 %177 }
  0xaa   : > { %vm179_vm2 = vcmp.eq.s32.totalorder %v175_v12, %v178_v13 }
  0xab   : > { %v180_v15 = vsel %vm179_vm2, %v160_v6, 0.0 }
  0xac   : > { %v181_v17 = vsel %vm161_vm0, %v180_v15, 0.0 }
  0xb0   : > { %v308_v14 = vpop.eup %307 }
  0xb1   : > { %v168_v16 = vsel %vm161_vm0, %v308_v14, 0.0 }
  0xb2   : > { %169 = vadd.xlane.f32.xlu1 %v168_v16 }
  0xb6   : > { %182 = vadd.xlane.f32.xlu1 %v181_v17 }
 0x13f   : > { %v170_v18 = vpop.xlane.xlu1 %169 }
 0x140   : > { %309 = vlog2.f32 %v170_v18 }
 0x143   : > { %v183_v21 = vpop.xlane.xlu1 %182 }
 0x14a   : > { %v310_v19 = vpop.eup %309 }
 0x14b   : > { %v172_v20 = vmul.f32 0.6931472, %v310_v19 }
 0x14d   : > { %v173_v22 = vadd.f32 %v172_v20, %v164_v9 }
 0x14f   : > { %v184_v23 = vsub.f32 %v173_v22, %v183_v21 }
 0x151   : > { %v185_v24 = vsel %vm157_vm1, %v184_v23, 0.0 }
 0x152   : > { %v188_v25 = vsel %vm187_vm3, %v185_v24, 0.0 }
 0x153   : > { %189 = vadd.xlane.f32.xlu1 %v188_v25 }
 0x1e0   : > { %v190_v26 = vpop.xlane.xlu1 %189 }
 0x1e1   : > { %v191_v27 = vrot.slane %v190_v26, 4 }
 0x1e3   : > { %v192_v28 = vadd.f32 %v191_v27, %v190_v26 }
 0x1e5   : > { %v193_v29 = vrot.slane %v192_v28, 2 }
 0x1e7   : > { %v194_v30 = vadd.f32 %v193_v29, %v192_v28 }
 0x1e9   : > { %v195_v31 = vrot.slane %v194_v30, 1 }
 0x1eb   : > { %v196_v32 = vadd.f32 %v195_v31, %v194_v30 }
 0x1ed   : > { %281 = vpush %v196_v32 }
 0x21e   : > { %s282_s22 = spop %281 }
 0x21f   : > { %s198_s23 = sadd.f32 %s282_s22, %s186_s21 }
 0x221   : > { %200 = sst [smem:[#allocation2]] %s198_s23  ;;  %s208_s24 = smul.f32 0.05, %s198_s23 }
 0x223   : > { %286 = sst [smem:[#allocation3]] (%p292_p5), %s208_s24 }
 0x224   : > { %322 = shalt.err (!%p319_p10)
}
 0x225   : > { %s337_s4 = smov [#allocation3]  }
 0x226   : > { %288 = dma.smem_to_hbm (%p292_p5), %s337_s4, 16, %s406_s2, [#allocation4]  }
 0x227   : > { %328 = dma.done.wait (%p292_p5), [#allocation4], 16  }
 0x228   : > { %330 = vsyncadd (%p292_p5), [#allocation4], 4294967280 }
 0x229   : > { %224 = sfence }
 0x22a PF: > { %s13_s9 = sadd.s32 1, %s333_s9  }
 0x22b   : > { %p10_p11 = scmp.ge.s32.totalorder %s13_s9, 5  }
 0x22d   :  { %12 = sbr.rel (!%p10_p11) target bundleno = 1 (0x1), region = 69 }
 0x234   :  { %230 = vsyncpa [#allocation4], 1 }
 0x235   :  { %232 = vsyncpa [#allocation4 + $0x1], 1 }

</bundles_post_ra>
